<compile_context>
chip_gen: v7x
topology: tpu7x:2x2x1
jax: 0.10.0
libtpu: 0.0.40
codegen_flags: <defaults>
</compile_context>

<pallas_src>
import functools

import jax
import jax.numpy as jnp
from jax.experimental import pallas as pl
from jax.experimental.pallas import tpu as pltpu

INPUT_DIM = 24
HIDDEN = 128
NUM_CLASSES = 10

_MAX_TILE_B = 2048   # max batch rows per grid step


def _round_up(n: int, m: int) -> int:
    return ((n + m - 1) // m) * m


def _cdiv(a: int, b: int) -> int:
    return (a + b - 1) // b


def _choose_tile_b(batch: int) -> int:
    """Pick a batch tile: >=2 balanced tiles for non-trivial batches (two v7x
    TensorCores), each <= _MAX_TILE_B rows, multiple of 8 sublanes."""
    max_rows = _round_up(batch, 8)
    if batch <= 8:
        return max_rows
    n_tiles = max(2, _cdiv(batch, _MAX_TILE_B))
    return min(_round_up(_cdiv(batch, n_tiles), 8), max_rows)


def _mlp_kernel(x_ref, w1_ref, b1_ref, w2_ref, b2_ref, w3_ref, b3_ref, o_ref):
    # In-kernel f32 -> bf16 cast of the streamed activations (hides under MXU).
    x = x_ref[...].astype(jnp.bfloat16)

    # Layer 1: Linear(in_dim -> hidden) + ReLU   (bf16 operands, f32 accumulate)
    h1 = jnp.dot(x, w1_ref[...], preferred_element_type=jnp.float32)
    h1 = jnp.maximum(h1 + b1_ref[...], 0.0)

    # Dropout(0.3): identity at inference time (eval mode).
    # TODO(synk): training-mode dropout (stateful PRNG mask + 1/(1-p) scale) not emitted here.

    # Layer 2: Linear(hidden -> hidden//2) + ReLU
    h2 = jnp.dot(h1.astype(jnp.bfloat16), w2_ref[...],
                 preferred_element_type=jnp.float32)
    h2 = jnp.maximum(h2 + b2_ref[...], 0.0)

    # Layer 3: Linear(hidden//2 -> out_dim), raw logits (BCEWithLogits applies
    # sigmoid inside the loss).
    out = jnp.dot(h2.astype(jnp.bfloat16), w3_ref[...],
                  preferred_element_type=jnp.float32)
    o_ref[...] = (out + b3_ref[...]).astype(o_ref.dtype)


def prepare_params(w1, b1, w2, b2, w3, b3):
    """One-time parameter prep (outside the hot path): bf16 matmul weights,
    f32 biases.  Call once; reuse the result for every forward call."""
    return (w1.astype(jnp.bfloat16), b1,
            w2.astype(jnp.bfloat16), b2,
            w3.astype(jnp.bfloat16), b3)


@jax.jit
def online_router_forward(x, w1, b1, w2, b2, w3, b3):
    """x: (B, in_dim) float32; w* already bf16 (see prepare_params) -> (B, out_dim) f32 logits."""
    B, in_dim = x.shape
    hidden = w1.shape[1]
    h2_dim = w2.shape[1]
    out_dim = w3.shape[1]

    tile_b = _choose_tile_b(B)
    n_tiles = _cdiv(B, tile_b)   # ragged last tile handled by Pallas (masked stores)

    const = lambda shape: pl.BlockSpec(shape, lambda i: tuple(0 for _ in shape))

    flops = 2 * B * (in_dim * hidden + hidden * h2_dim + h2_dim * out_dim)
    bytes_accessed = (
        B * in_dim * 4                                                  # x (f32) in
        + B * out_dim * 4                                               # logits (f32) out
        + (in_dim * hidden + hidden * h2_dim + h2_dim * out_dim) * 2    # weights (bf16)
        + (hidden + h2_dim + out_dim) * 4                               # biases (f32)
    )

    return pl.pallas_call(
        _mlp_kernel,
        out_shape=jax.ShapeDtypeStruct((B, out_dim), jnp.float32),
        grid_spec=pltpu.PrefetchScalarGridSpec(
            num_scalar_prefetch=0,
            grid=(n_tiles,),
            in_specs=[
                pl.BlockSpec((tile_b, in_dim), lambda i: (i, 0)),  # x: streamed
                const(w1.shape), const(b1.shape),                  # weights: VMEM-resident
                const(w2.shape), const(b2.shape),
                const(w3.shape), const(b3.shape),
            ],
            out_specs=pl.BlockSpec((tile_b, out_dim), lambda i: (i, 0)),
        ),
        compiler_params=pltpu.CompilerParams(
            dimension_semantics=("parallel",),
        ),
        cost_estimate=pl.CostEstimate(
            flops=flops, transcendentals=0, bytes_accessed=bytes_accessed),
    )(x, w1, b1, w2, b2, w3, b3)


def _xavier_uniform(key, fan_in, fan_out):
    bound = jnp.sqrt(6.0 / (fan_in + fan_out))
    return jax.random.uniform(key, (fan_in, fan_out), jnp.float32, -bound, bound)


def init_params(key, in_dim=INPUT_DIM, hidden=HIDDEN, out_dim=NUM_CLASSES):
    k1, k2, k3 = jax.random.split(key, 3)
    h2 = hidden // 2
    w1 = _xavier_uniform(k1, in_dim, hidden)
    b1 = jnp.zeros((1, hidden), jnp.float32)
    w2 = _xavier_uniform(k2, hidden, h2)
    b2 = jnp.zeros((1, h2), jnp.float32)
    w3 = _xavier_uniform(k3, h2, out_dim)
    b3 = jnp.zeros((1, out_dim), jnp.float32)
    return w1, b1, w2, b2, w3, b3


def _reference_bf16(x, w1, b1, w2, b2, w3, b3):
    """Plain-JAX reference mirroring the kernel's bf16-operand / f32-accum arithmetic."""
    h1 = jnp.dot(x.astype(jnp.bfloat16), w1.astype(jnp.bfloat16),
                 preferred_element_type=jnp.float32)
    h1 = jnp.maximum(h1 + b1, 0.0)
    h2 = jnp.dot(h1.astype(jnp.bfloat16), w2.astype(jnp.bfloat16),
                 preferred_element_type=jnp.float32)
    h2 = jnp.maximum(h2 + b2, 0.0)
    out = jnp.dot(h2.astype(jnp.bfloat16), w3.astype(jnp.bfloat16),
                  preferred_element_type=jnp.float32)
    return out + b3


if __name__ == "__main__":
    key = jax.random.PRNGKey(0)
    k_params, k_x = jax.random.split(key)

    params = init_params(k_params)
    prepped = prepare_params(*params)

    B = 8
    x = jax.random.normal(k_x, (B, INPUT_DIM), jnp.float32)

    logits = online_router_forward(x, *prepped)
    jax.block_until_ready(logits)

    assert logits.shape == (B, NUM_CLASSES)

    # sanity-check against a plain-JAX reference with matching bf16 matmul operands
    ref_bf16 = _reference_bf16(x, *params)
    assert jnp.allclose(logits, ref_bf16, atol=1e-2, rtol=1e-2)

    # and against the pure-f32 reference with a looser (bf16-appropriate) tolerance
    w1, b1, w2, b2, w3, b3 = params
    h1 = jnp.maximum(x @ w1 + b1, 0.0)
    h2 = jnp.maximum(h1 @ w2 + b2, 0.0)
    ref_f32 = h2 @ w3 + b3
    assert jnp.allclose(logits, ref_f32, atol=5e-2, rtol=5e-2)

    print("KERNEL_OK")
</pallas_src>

<mosaic_0001>
module attributes {stable_mosaic.version = 11 : i64} {
  func.func @_mlp_kernel(%arg0: i32, %arg1: memref<8x24xf32, #tpu.memory_space<vmem>>, %arg2: memref<24x128xbf16, #tpu.memory_space<vmem>>, %arg3: memref<1x128xf32, #tpu.memory_space<vmem>>, %arg4: memref<128x64xbf16, #tpu.memory_space<vmem>>, %arg5: memref<1x64xf32, #tpu.memory_space<vmem>>, %arg6: memref<64x10xbf16, #tpu.memory_space<vmem>>, %arg7: memref<1x10xf32, #tpu.memory_space<vmem>>, %arg8: memref<8x10xf32, #tpu.memory_space<vmem>>) attributes {dimension_semantics = [#tpu.dimension_semantics<parallel>], iteration_bounds = array<i64: 1>, scalar_prefetch = 0 : i64, scratch_operands = 0 : i64, tpu.core_type = #tpu.core_type<tc>, window_params = [{transform_indices = @transform_0, window_bounds = array<i64: 8, 24>}, {pipeline_mode = #tpu.pipeline_mode<synchronous>, transform_indices = @transform_1, window_bounds = array<i64: 24, 128>}, {pipeline_mode = #tpu.pipeline_mode<synchronous>, transform_indices = @transform_2, window_bounds = array<i64: 1, 128>}, {pipeline_mode = #tpu.pipeline_mode<synchronous>, transform_indices = @transform_3, window_bounds = array<i64: 128, 64>}, {pipeline_mode = #tpu.pipeline_mode<synchronous>, transform_indices = @transform_4, window_bounds = array<i64: 1, 64>}, {pipeline_mode = #tpu.pipeline_mode<synchronous>, transform_indices = @transform_5, window_bounds = array<i64: 64, 10>}, {pipeline_mode = #tpu.pipeline_mode<synchronous>, transform_indices = @transform_6, window_bounds = array<i64: 1, 10>}, {transform_indices = @transform_7, window_bounds = array<i64: 8, 10>}]} {
    %c0 = arith.constant 0 : index
    %c0_0 = arith.constant 0 : index
    %0 = vector.load %arg1[%c0, %c0_0] : memref<8x24xf32, #tpu.memory_space<vmem>>, vector<8x24xf32>
    %1 = arith.truncf %0 : vector<8x24xf32> to vector<8x24xbf16>
    %c0_1 = arith.constant 0 : index
    %c0_2 = arith.constant 0 : index
    %2 = vector.load %arg2[%c0_1, %c0_2] : memref<24x128xbf16, #tpu.memory_space<vmem>>, vector<24x128xbf16>
    %cst = arith.constant dense<0.000000e+00> : vector<8x128xf32>
    %3 = tpu.matmul %1, %2, %cst {dimension_numbers = #tpu.dot_dimension_numbers<[1], [0], [0], [1], [0, 0, 1, 1], [], []>} : vector<8x24xbf16>, vector<24x128xbf16>, vector<8x128xf32> -> vector<8x128xf32>
    %c0_3 = arith.constant 0 : index
    %c0_4 = arith.constant 0 : index
    %4 = vector.load %arg3[%c0_3, %c0_4] : memref<1x128xf32, #tpu.memory_space<vmem>>, vector<1x128xf32>
    %5 = vector.broadcast %4 : vector<1x128xf32> to vector<8x128xf32>
    %6 = arith.addf %3, %5 : vector<8x128xf32>
    %cst_5 = arith.constant 0.000000e+00 : f32
    %7 = vector.broadcast %cst_5 : f32 to vector<8x128xf32>
    %8 = arith.maximumf %6, %7 : vector<8x128xf32>
    %9 = arith.truncf %8 : vector<8x128xf32> to vector<8x128xbf16>
    %c0_6 = arith.constant 0 : index
    %c0_7 = arith.constant 0 : index
    %10 = vector.load %arg4[%c0_6, %c0_7] : memref<128x64xbf16, #tpu.memory_space<vmem>>, vector<128x64xbf16>
    %cst_8 = arith.constant dense<0.000000e+00> : vector<8x64xf32>
    %11 = tpu.matmul %9, %10, %cst_8 {dimension_numbers = #tpu.dot_dimension_numbers<[1], [0], [0], [1], [0, 0, 1, 1], [], []>} : vector<8x128xbf16>, vector<128x64xbf16>, vector<8x64xf32> -> vector<8x64xf32>
    %c0_9 = arith.constant 0 : index
    %c0_10 = arith.constant 0 : index
    %12 = vector.load %arg5[%c0_9, %c0_10] : memref<1x64xf32, #tpu.memory_space<vmem>>, vector<1x64xf32>
    %13 = vector.broadcast %12 : vector<1x64xf32> to vector<8x64xf32>
    %14 = arith.addf %11, %13 : vector<8x64xf32>
    %cst_11 = arith.constant 0.000000e+00 : f32
    %15 = vector.broadcast %cst_11 : f32 to vector<8x64xf32>
    %16 = arith.maximumf %14, %15 : vector<8x64xf32>
    %17 = arith.truncf %16 : vector<8x64xf32> to vector<8x64xbf16>
    %c0_12 = arith.constant 0 : index
    %c0_13 = arith.constant 0 : index
    %18 = vector.load %arg6[%c0_12, %c0_13] : memref<64x10xbf16, #tpu.memory_space<vmem>>, vector<64x10xbf16>
    %cst_14 = arith.constant dense<0.000000e+00> : vector<8x10xf32>
    %19 = tpu.matmul %17, %18, %cst_14 {dimension_numbers = #tpu.dot_dimension_numbers<[1], [0], [0], [1], [0, 0, 1, 1], [], []>} : vector<8x64xbf16>, vector<64x10xbf16>, vector<8x10xf32> -> vector<8x10xf32>
    %c0_15 = arith.constant 0 : index
    %c0_16 = arith.constant 0 : index
    %20 = vector.load %arg7[%c0_15, %c0_16] : memref<1x10xf32, #tpu.memory_space<vmem>>, vector<1x10xf32>
    %21 = vector.broadcast %20 : vector<1x10xf32> to vector<8x10xf32>
    %22 = arith.addf %19, %21 : vector<8x10xf32>
    %c0_17 = arith.constant 0 : index
    %c0_18 = arith.constant 0 : index
    %23 = vector.load %arg8[%c0_17, %c0_18] : memref<8x10xf32, #tpu.memory_space<vmem>>, vector<8x10xf32>
    tpu.vector_store %arg8[%c0_17, %c0_18], %22 {strides = array<i32>} : memref<8x10xf32, #tpu.memory_space<vmem>>, vector<8x10xf32>,
    return
  }
  func.func @transform_0(%arg0: i32) -> (i32, i32) {
    %c0_i32 = arith.constant 0 : i32
    %c0_i32_0 = arith.constant 0 : i32
    return %arg0, %c0_i32 : i32, i32
  }
  func.func @transform_1(%arg0: i32) -> (i32, i32) {
    %c0_i32 = arith.constant 0 : i32
    %c0_i32_0 = arith.constant 0 : i32
    %c0_i32_1 = arith.constant 0 : i32
    return %c0_i32, %c0_i32_0 : i32, i32
  }
  func.func @transform_2(%arg0: i32) -> (i32, i32) {
    %c0_i32 = arith.constant 0 : i32
    %c0_i32_0 = arith.constant 0 : i32
    %c0_i32_1 = arith.constant 0 : i32
    return %c0_i32, %c0_i32_0 : i32, i32
  }
  func.func @transform_3(%arg0: i32) -> (i32, i32) {
    %c0_i32 = arith.constant 0 : i32
    %c0_i32_0 = arith.constant 0 : i32
    %c0_i32_1 = arith.constant 0 : i32
    return %c0_i32, %c0_i32_0 : i32, i32
  }
  func.func @transform_4(%arg0: i32) -> (i32, i32) {
    %c0_i32 = arith.constant 0 : i32
    %c0_i32_0 = arith.constant 0 : i32
    %c0_i32_1 = arith.constant 0 : i32
    return %c0_i32, %c0_i32_0 : i32, i32
  }
  func.func @transform_5(%arg0: i32) -> (i32, i32) {
    %c0_i32 = arith.constant 0 : i32
    %c0_i32_0 = arith.constant 0 : i32
    %c0_i32_1 = arith.constant 0 : i32
    return %c0_i32, %c0_i32_0 : i32, i32
  }
  func.func @transform_6(%arg0: i32) -> (i32, i32) {
    %c0_i32 = arith.constant 0 : i32
    %c0_i32_0 = arith.constant 0 : i32
    %c0_i32_1 = arith.constant 0 : i32
    return %c0_i32, %c0_i32_0 : i32, i32
  }
  func.func @transform_7(%arg0: i32) -> (i32, i32) {
    %c0_i32 = arith.constant 0 : i32
    %c0_i32_0 = arith.constant 0 : i32
    return %arg0, %c0_i32 : i32, i32
  }
}

</mosaic_0001>

<bundles_post_ra>
// kernel: online_router_forward.1
= control target key start
LH: loop header
LB: loop body
LE: loop exit
PB: predicated region body
PF: predicated region fallthrough
CT: control target
= control target key end

     0   :  { %v428_v1 = vmov 0.0   ;;  %vm53_vm0 = vcmask 1043456   ;;  %vm429_vm1 = vmmov 0   ;;  %vm49_vm2 = vcmask 195584   ;;  %s540_s0 = inlined_call_operand.vmem [shape: f32[8,24], index: 0, kind: input, shape index: {}]   ;;  %s541_s1 = inlined_call_operand.vmem [shape: bf16[24,128], index: 1, kind: input, shape index: {}]   ;;  %s542_s2 = inlined_call_operand.vmem [shape: f32[1,128], index: 2, kind: input, shape index: {}]   ;;  %s543_s3 = inlined_call_operand.vmem [shape: bf16[128,64], index: 3, kind: input, shape index: {}]   ;;  %s544_s4 = inlined_call_operand.vmem [shape: f32[1,64], index: 4, kind: input, shape index: {}]   ;;  %s545_s5 = inlined_call_operand.vmem [shape: bf16[64,10], index: 5, kind: input, shape index: {}]   ;;  %s546_s6 = inlined_call_operand.vmem [shape: f32[1,10], index: 6, kind: input, shape index: {}]   ;;  %s547_s7 = inlined_call_operand.hbm [shape: f32[8,10], index: 7, kind: output, shape index: {}]  }
   0x1   :  { %v390_v0 = vld [vmem:[%s541_s1] sm:$0xff]   ;;  %347 = vmatprep.subr.bf16.mxu0 %v428_v1  ;;  %v391_v2 = vld [vmem:[%s541_s1 + $0x8] ss:$0 sps:$4 sm:$0xff]   ;;  %355 = vmatprep.subr.bf16.mxu1 %v428_v1  ;;  %v394_v8 = vld [vmem:[%s543_s3 + $0x10] sm:$0xff]  }
   0x2   :  { %348 = vmatpush3.bf16.msra.mxu0 %v390_v0  ;;  %351 = vmatprep.mubr.msk.bf16.mxu0 %vm429_vm1, %v428_v1  ;;  %v28_v3 = vld [vmem:[%s540_s0] sm:$0xff]  ;;  %v55_v4 = vsel %vm53_vm0, %v391_v2, 0  ;;  %v393_v7 = vld [vmem:[%s543_s3 + $0x8] sm:$0xff]  }
   0x3   :  { %349 = vmatprep.subr.bf16.mxu0 %v428_v1  ;;  %v392_v5 = vld [vmem:[%s543_s3] sm:$0xff]   ;;  %371 = vmatprep.mubr.msk.bf16.mxu1 %vm429_vm1, %v428_v1  ;;  %v29_v6 = vpack.c.bf16 %v28_v3, %v28_v3 }
   0x4   :  { %356 = vmatpush3.bf16.msra.mxu1 %v392_v5 }
   0x5   :  { %357 = vmatprep.subr.bf16.mxu1 %v428_v1 }
   0x6   :  { %350 = vmatpush3.bf16.msra.mxu0 %v55_v4 }
   0x7   :  { %375 = vmatprep.subr.bf16.mxu0 %v428_v1 }
   0x8   :  { %358 = vmatpush3.bf16.msra.mxu1 %v393_v7 }
   0x9   :  { %352 = vmatmul.mubr.msk.bf16.vlgmr.msra.gmra.mrb[0].mxu0 %vm49_vm2, %v29_v6  ;;  %359 = vmatprep.subr.bf16.mxu1 %v428_v1 }
   0xa   :  { %383 = vmatprep.mubr.msk.bf16.mxu0 %vm429_vm1, %v428_v1 }
   0xb   :  { %12 = vsyncpa [#allocation3], 0  ;;  %v395_v9 = vld [vmem:[%s543_s3 + $0x18] sm:$0xff]   ;;  %v396_v10 = vld [vmem:[%s543_s3 + $0x20] sm:$0xff]   ;;  %vm251_vm3 = vcmask 523264   ;;  %s430_s9 = smov [#allocation2]  }
   0xc   :  { %360 = vmatpush3.bf16.msra.mxu1 %v394_v8  ;;  %v397_v11 = vld [vmem:[%s543_s3 + $0x28] sm:$0xff]   ;;  %v398_v12 = vld [vmem:[%s543_s3 + $0x30] sm:$0xff]   ;;  %v399_v13 = vld [vmem:[%s543_s3 + $0x38] sm:$0xff]   ;;  %vm295_vm4 = vcmask 80896  }
   0xd   :  { %361 = vmatprep.subr.bf16.mxu1 %v428_v1  ;;  %v400_v14 = vld [vmem:[%s545_s5] sm:$0xff]   ;;  %v401_v15 = vld [vmem:[%s545_s5 + $0x8] sm:$0xff]   ;;  %v402_v24 = vld [vmem:[%s545_s5 + $0x10] sm:$0xff]  }
   0xe   :  { %376 = vmatpush3.bf16.msra.mxu0 %v400_v14  ;;  %v311_v16 = vld [vmem:[%s542_s2] ss:$0 sm:$0xff]  ;;  %v403_v25 = vld [vmem:[%s545_s5 + $0x18] sm:$0xff]   ;;  %s303_s5 = sshll.u32 %s430_s9, 4  ;;  %s304_s5 = int_to_ptr.vmem [resolvable:$true] %s303_s5 }
   0xf   :  { %377 = vmatprep.subr.bf16.mxu0 %v428_v1  ;;  %v315_v26 = vld [vmem:[%s544_s4] ss:$0 sm:$0xff]  ;;  %s404_s4 = scalar_lea.vmem %s304_s5, 128  ;;  %p409_p1 = scmp.lt.s32.totalorder %s304_s5, %s304_s5 }
  0x10   :  { %362 = vmatpush3.bf16.msra.mxu1 %v395_v9  ;;  %v324_v34 = vld [vmem:[%s546_s6] ss:$0 sm:$0xff]  ;;  %p405_p0 = scmp.ne.s32.totalorder %s304_s5, %s404_s4  ;;  %p410_p2 = scmp.lt.s32.totalorder %s404_s4, %s404_s4 }
  0x11   :  { %363 = vmatprep.subr.bf16.mxu1 %v428_v1 }
  0x12   :  { %378 = vmatpush3.bf16.msra.mxu0 %v401_v15  ;;  %p411_p3 = por %p410_p2, %p409_p1 }
  0x13   :  { %379 = vmatprep.subr.bf16.mxu0 %v428_v1 }
  0x14   :  { %364 = vmatpush3.bf16.msra.mxu1 %v396_v10  ;;  %p412_p4 = pnand %p411_p3, %p405_p0 }
  0x15   :  { %365 = vmatprep.subr.bf16.mxu1 %v428_v1 }
  0x16   :  { %380 = vmatpush3.bf16.msra.mxu0 %v402_v24 }
  0x17   :  { %381 = vmatprep.subr.bf16.mxu0 %v428_v1 }
  0x18   :  { %366 = vmatpush3.bf16.msra.mxu1 %v397_v11 }
  0x19   :  { %367 = vmatprep.subr.bf16.mxu1 %v428_v1 }
  0x1a   :  { %382 = vmatpush3.bf16.msra.mxu0 %v403_v25 }
  0x1c   :  { %368 = vmatpush3.bf16.msra.mxu1 %v398_v12 }
  0x1d   :  { %369 = vmatprep.subr.bf16.mxu1 %v428_v1 }
  0x20   :  { %370 = vmatpush3.bf16.msra.mxu1 %v399_v13 }
  0xdc   :  { %v91_v17 = vpop.f32.mrb[0].mxu0 }
  0xdd   :  { %v92_v18 = vadd.f32 %v311_v16, %v91_v17  ;;  %v353_v19 = vpop.f32.mrb[1].mxu0 }
  0xde   :  { %v94_v20 = vpop.f32.mrb[2].mxu0 }
  0xdf   :  { %v97_v21 = vmax.f32 %v92_v18, 0.0  ;;  %v354_v22 = vpop.f32.mrb[3].mxu0 }
  0xe1   :  { %v98_v23 = vpack.c.bf16 %v97_v21, %v97_v21 }
  0xe3   :  { %372 = vmatmul.mubr.bf16.vlgmr.msra.gmra.mrb[0].mxu1 %v98_v23 }
 0x1b6   :  { %v204_v27 = vpop.f32.mrb[0].mxu1 }
 0x1b7   :  { %v205_v28 = vadd.f32 %v315_v26, %v204_v27  ;;  %v373_v29 = vpop.f32.mrb[1].mxu1 }
 0x1b8   :  { %v207_v30 = vpop.f32.mrb[2].mxu1 }
 0x1b9   :  { %v210_v31 = vmax.f32 %v205_v28, 0.0  ;;  %v374_v32 = vpop.f32.mrb[3].mxu1 }
 0x1bb   :  { %v211_v33 = vpack.c.bf16 %v210_v31, %v210_v31 }
 0x1bd   :  { %384 = vmatmul.mubr.msk.bf16.vlgmr.msra.gmra.mrb[4].mxu0 %vm251_vm3, %v211_v33 }
 0x290   :  { %v289_v35 = vpop.f32.mrb[4].mxu0 }
 0x291   :  { %v290_v36 = vadd.f32 %v324_v34, %v289_v35  ;;  %v385_v37 = vpop.f32.mrb[5].mxu0 }
 0x292   :  { %v292_v38 = vpop.f32.mrb[6].mxu0 }
 0x293   :  { %v386_v39 = vpop.f32.mrb[7].mxu0  ;;  %296 = vst.msk [vmem:[#allocation2] sm:$0xff] %vm295_vm4, %v290_v36 }
 0x294   :  { %415 = shalt.err (!%p412_p4)
}
 0x295   :  { %s416_s6 = scalar_lea.hbm %s547_s7, 128 }
 0x296   :  { %p417_p5 = scmp.ne.s32.totalorder %s547_s7, %s416_s6  ;;  %p420_p6 = scmp.lt.u32.totalorder %s416_s6, %s547_s7 }
 0x298   :  { %p422_p7 = pnand %p420_p6, %p417_p5 }
 0x29a   :  { %425 = shalt.err (!%p422_p7)
}
 0x29b   :  { %306 = dma.vmem_to_hbm [thread:$0]  %s304_s5, 128, %s547_s7, [#allocation3]  }
 0x29c   :  { %426 = dma.done.wait [#allocation3], 128  }
 0x29d   :  { %427 = vsyncadd [#allocation3], 4294967168 }
 0x29e   :  { %310 = vsyncpa [#allocation3], 1 }

</bundles_post_ra>
